<compile_context>
chip_gen: v6e
topology: v6e:2x2x1
jax: 0.10.0
libtpu: 0.0.40
codegen_flags: <defaults>
</compile_context>

<pallas_src>
import math

import jax
import jax.numpy as jnp
from jax.experimental import pallas as pl
from jax.experimental.pallas import tpu as pltpu


def _data_embedding_kernel(xm1_ref, x0_ref, xp1_ref,
                           w0_ref, w1_ref, w2_ref, pe_ref, o_ref):
    # Blocks: x*_ref (1, TL, C), w*_ref (C, D), pe_ref (TL, D), o_ref (1, TL, D)
    acc = jnp.dot(xm1_ref[0], w0_ref[...], preferred_element_type=jnp.float32)
    acc = acc + jnp.dot(x0_ref[0], w1_ref[...], preferred_element_type=jnp.float32)
    acc = acc + jnp.dot(xp1_ref[0], w2_ref[...], preferred_element_type=jnp.float32)
    # Fused epilogue: add positional embedding, write lane-dense (TL, D) tile.
    o_ref[0] = (acc + pe_ref[...].astype(jnp.float32)).astype(o_ref.dtype)


def make_positional_embedding(length, d_model):
    """Sinusoidal PE, matches the PyTorch PositionalEmbedding buffer (d_model even)."""
    position = jnp.arange(length, dtype=jnp.float32)[:, None]
    div_term = jnp.exp(
        jnp.arange(0, d_model, 2, dtype=jnp.float32) * (-math.log(10000.0) / d_model)
    )
    angle = position * div_term  # (L, d_model//2)
    pe = jnp.zeros((length, d_model), dtype=jnp.float32)
    pe = pe.at[:, 0::2].set(jnp.sin(angle))
    pe = pe.at[:, 1::2].set(jnp.cos(angle))
    return pe


def _pick_seq_tile(L, target=512):
    """Largest multiple-of-8 divisor of L <= target; full L if L is small / awkward."""
    if L <= target:
        return L
    t = (target // 8) * 8
    while t >= 8:
        if L % t == 0:
            return t
        t -= 8
    return L  # fall back to a single (full-length) block


def data_embedding_forward(x, weight, *, seq_tile=None):
    """Pallas implementation of DataEmbedding.forward (dropout p=0.0 => identity).

    x:      (B, L, c_in)       float32
    weight: (d_model, c_in, 3) float32   (Conv1d weight, circular pad, no bias)
    returns (B, L, d_model)
    """
    B, L, C = x.shape
    D, C_w, K = weight.shape
    assert C == C_w and K == 3
    assert D % 2 == 0, "d_model must be even for the sinusoidal positional embedding"

    TL = seq_tile if seq_tile is not None else _pick_seq_tile(L)
    assert L % TL == 0 and (TL == L or TL % 8 == 0)
    num_l_tiles = L // TL

    # Circular padding=1, kernel 3: out[l] uses x[l-1], x[l], x[l+1] (mod L).
    x_m1 = jnp.roll(x, 1, axis=1)
    x_p1 = jnp.roll(x, -1, axis=1)

    # Per-tap weight slabs: w_k[c, d] = weight[d, c, k]
    w0 = weight[:, :, 0].T
    w1 = weight[:, :, 1].T
    w2 = weight[:, :, 2].T

    pe = make_positional_embedding(L, D).astype(x.dtype)

    x_spec = pl.BlockSpec((1, TL, C), lambda j, b: (b, j, 0))
    w_spec = pl.BlockSpec((C, D), lambda j, b: (0, 0))       # resident, DMA elided
    pe_spec = pl.BlockSpec((TL, D), lambda j, b: (j, 0))     # constant over inner b axis
    out_spec = pl.BlockSpec((1, TL, D), lambda j, b: (b, j, 0))

    cost = pl.CostEstimate(
        flops=2 * B * L * 3 * C * D,
        transcendentals=0,
        bytes_accessed=4 * (3 * B * L * C + 3 * C * D + L * D + B * L * D),
    )

    out = pl.pallas_call(
        _data_embedding_kernel,
        out_shape=jax.ShapeDtypeStruct((B, L, D), x.dtype),
        grid=(num_l_tiles, B),
        in_specs=[x_spec, x_spec, x_spec, w_spec, w_spec, w_spec, pe_spec],
        out_specs=out_spec,
        compiler_params=pltpu.CompilerParams(
            dimension_semantics=("parallel", "parallel"),
        ),
        cost_estimate=cost,
    )(x_m1, x, x_p1, w0, w1, w2, pe)

    return out


def init_token_embedding_weight(key, c_in, d_model):
    """Kaiming-normal (fan_in, leaky_relu) init like the PyTorch Conv1d."""
    fan_in = c_in * 3
    gain = math.sqrt(2.0)  # leaky_relu, a=0
    std = gain / math.sqrt(fan_in)
    return std * jax.random.normal(key, (d_model, c_in, 3), dtype=jnp.float32)


def _reference_forward(x, weight):
    """Plain-JAX reference of DataEmbedding (circular conv + positional embedding)."""
    x_m1 = jnp.roll(x, 1, axis=1)
    x_p1 = jnp.roll(x, -1, axis=1)
    tok = (
        jnp.einsum("blc,dc->bld", x_m1, weight[:, :, 0])
        + jnp.einsum("blc,dc->bld", x, weight[:, :, 1])
        + jnp.einsum("blc,dc->bld", x_p1, weight[:, :, 2])
    )
    pe = make_positional_embedding(x.shape[1], weight.shape[0])
    return tok + pe[None, :, :]


if __name__ == "__main__":
    B, L, C_IN, D_MODEL = 2, 8, 4, 32

    key = jax.random.PRNGKey(0)
    kx, kw = jax.random.split(key)
    x = jax.random.normal(kx, (B, L, C_IN), dtype=jnp.float32)
    weight = init_token_embedding_weight(kw, C_IN, D_MODEL)

    out = jax.block_until_ready(data_embedding_forward(x, weight))
    ref = jax.block_until_ready(_reference_forward(x, weight))

    assert out.shape == (B, L, D_MODEL)
    assert jnp.allclose(out, ref, atol=1e-5, rtol=1e-5)

    print("KERNEL_OK")
</pallas_src>

<mosaic_0001>
module attributes {stable_mosaic.version = 11 : i64} {
  func.func @_data_embedding_kernel(%arg0: i32, %arg1: i32, %arg2: memref<1x8x4xf32, #tpu.memory_space<vmem>>, %arg3: memref<1x8x4xf32, #tpu.memory_space<vmem>>, %arg4: memref<1x8x4xf32, #tpu.memory_space<vmem>>, %arg5: memref<4x32xf32, #tpu.memory_space<vmem>>, %arg6: memref<4x32xf32, #tpu.memory_space<vmem>>, %arg7: memref<4x32xf32, #tpu.memory_space<vmem>>, %arg8: memref<8x32xf32, #tpu.memory_space<vmem>>, %arg9: memref<1x8x32xf32, #tpu.memory_space<vmem>>) attributes {dimension_semantics = [#tpu.dimension_semantics<parallel>, #tpu.dimension_semantics<parallel>], iteration_bounds = array<i64: 1, 2>, scalar_prefetch = 0 : i64, scratch_operands = 0 : i64, tpu.core_type = #tpu.core_type<tc>, window_params = [{transform_indices = @transform_0, window_bounds = array<i64: 1, 8, 4>}, {transform_indices = @transform_1, window_bounds = array<i64: 1, 8, 4>}, {transform_indices = @transform_2, window_bounds = array<i64: 1, 8, 4>}, {pipeline_mode = #tpu.pipeline_mode<synchronous>, transform_indices = @transform_3, window_bounds = array<i64: 4, 32>}, {pipeline_mode = #tpu.pipeline_mode<synchronous>, transform_indices = @transform_4, window_bounds = array<i64: 4, 32>}, {pipeline_mode = #tpu.pipeline_mode<synchronous>, transform_indices = @transform_5, window_bounds = array<i64: 4, 32>}, {transform_indices = @transform_6, window_bounds = array<i64: 8, 32>}, {transform_indices = @transform_7, window_bounds = array<i64: 1, 8, 32>}]} {
    %c0 = arith.constant 0 : index
    %c0_0 = arith.constant 0 : index
    %c0_1 = arith.constant 0 : index
    %0 = vector.load %arg2[%c0, %c0_0, %c0_1] : memref<1x8x4xf32, #tpu.memory_space<vmem>>, vector<1x8x4xf32>
    %1 = vector.shape_cast %0 : vector<1x8x4xf32> to vector<8x4xf32>
    %c0_2 = arith.constant 0 : index
    %c0_3 = arith.constant 0 : index
    %2 = vector.load %arg5[%c0_2, %c0_3] : memref<4x32xf32, #tpu.memory_space<vmem>>, vector<4x32xf32>
    %cst = arith.constant dense<0.000000e+00> : vector<8x32xf32>
    %3 = tpu.matmul %1, %2, %cst {dimension_numbers = #tpu.dot_dimension_numbers<[1], [0], [0], [1], [0, 0, 1, 1], [], []>} : vector<8x4xf32>, vector<4x32xf32>, vector<8x32xf32> -> vector<8x32xf32>
    %c0_4 = arith.constant 0 : index
    %c0_5 = arith.constant 0 : index
    %c0_6 = arith.constant 0 : index
    %4 = vector.load %arg3[%c0_4, %c0_5, %c0_6] : memref<1x8x4xf32, #tpu.memory_space<vmem>>, vector<1x8x4xf32>
    %5 = vector.shape_cast %4 : vector<1x8x4xf32> to vector<8x4xf32>
    %c0_7 = arith.constant 0 : index
    %c0_8 = arith.constant 0 : index
    %6 = vector.load %arg6[%c0_7, %c0_8] : memref<4x32xf32, #tpu.memory_space<vmem>>, vector<4x32xf32>
    %cst_9 = arith.constant dense<0.000000e+00> : vector<8x32xf32>
    %7 = tpu.matmul %5, %6, %cst_9 {dimension_numbers = #tpu.dot_dimension_numbers<[1], [0], [0], [1], [0, 0, 1, 1], [], []>} : vector<8x4xf32>, vector<4x32xf32>, vector<8x32xf32> -> vector<8x32xf32>
    %8 = arith.addf %3, %7 : vector<8x32xf32>
    %c0_10 = arith.constant 0 : index
    %c0_11 = arith.constant 0 : index
    %c0_12 = arith.constant 0 : index
    %9 = vector.load %arg4[%c0_10, %c0_11, %c0_12] : memref<1x8x4xf32, #tpu.memory_space<vmem>>, vector<1x8x4xf32>
    %10 = vector.shape_cast %9 : vector<1x8x4xf32> to vector<8x4xf32>
    %c0_13 = arith.constant 0 : index
    %c0_14 = arith.constant 0 : index
    %11 = vector.load %arg7[%c0_13, %c0_14] : memref<4x32xf32, #tpu.memory_space<vmem>>, vector<4x32xf32>
    %cst_15 = arith.constant dense<0.000000e+00> : vector<8x32xf32>
    %12 = tpu.matmul %10, %11, %cst_15 {dimension_numbers = #tpu.dot_dimension_numbers<[1], [0], [0], [1], [0, 0, 1, 1], [], []>} : vector<8x4xf32>, vector<4x32xf32>, vector<8x32xf32> -> vector<8x32xf32>
    %13 = arith.addf %8, %12 : vector<8x32xf32>
    %c0_16 = arith.constant 0 : index
    %c0_17 = arith.constant 0 : index
    %14 = vector.load %arg8[%c0_16, %c0_17] : memref<8x32xf32, #tpu.memory_space<vmem>>, vector<8x32xf32>
    %15 = arith.addf %13, %14 : vector<8x32xf32>
    %c0_18 = arith.constant 0 : index
    %c0_19 = arith.constant 0 : index
    %c0_20 = arith.constant 0 : index
    %16 = vector.load %arg9[%c0_18, %c0_19, %c0_20] : memref<1x8x32xf32, #tpu.memory_space<vmem>>, vector<1x8x32xf32>
    %17 = vector.shape_cast %16 : vector<1x8x32xf32> to vector<8x32xf32>
    %18 = vector.shape_cast %15 : vector<8x32xf32> to vector<1x8x32xf32>
    tpu.vector_store %arg9[%c0_18, %c0_19, %c0_20], %18 {strides = array<i32>} : memref<1x8x32xf32, #tpu.memory_space<vmem>>, vector<1x8x32xf32>,
    return
  }
  func.func @transform_0(%arg0: i32, %arg1: i32) -> (i32, i32, i32) {
    %c0_i32 = arith.constant 0 : i32
    %c0_i32_0 = arith.constant 0 : i32
    return %arg1, %arg0, %c0_i32 : i32, i32, i32
  }
  func.func @transform_1(%arg0: i32, %arg1: i32) -> (i32, i32, i32) {
    %c0_i32 = arith.constant 0 : i32
    %c0_i32_0 = arith.constant 0 : i32
    return %arg1, %arg0, %c0_i32 : i32, i32, i32
  }
  func.func @transform_2(%arg0: i32, %arg1: i32) -> (i32, i32, i32) {
    %c0_i32 = arith.constant 0 : i32
    %c0_i32_0 = arith.constant 0 : i32
    return %arg1, %arg0, %c0_i32 : i32, i32, i32
  }
  func.func @transform_3(%arg0: i32, %arg1: i32) -> (i32, i32) {
    %c0_i32 = arith.constant 0 : i32
    %c0_i32_0 = arith.constant 0 : i32
    %c0_i32_1 = arith.constant 0 : i32
    return %c0_i32, %c0_i32_0 : i32, i32
  }
  func.func @transform_4(%arg0: i32, %arg1: i32) -> (i32, i32) {
    %c0_i32 = arith.constant 0 : i32
    %c0_i32_0 = arith.constant 0 : i32
    %c0_i32_1 = arith.constant 0 : i32
    return %c0_i32, %c0_i32_0 : i32, i32
  }
  func.func @transform_5(%arg0: i32, %arg1: i32) -> (i32, i32) {
    %c0_i32 = arith.constant 0 : i32
    %c0_i32_0 = arith.constant 0 : i32
    %c0_i32_1 = arith.constant 0 : i32
    return %c0_i32, %c0_i32_0 : i32, i32
  }
  func.func @transform_6(%arg0: i32, %arg1: i32) -> (i32, i32) {
    %c0_i32 = arith.constant 0 : i32
    %c0_i32_0 = arith.constant 0 : i32
    return %arg0, %c0_i32 : i32, i32
  }
  func.func @transform_7(%arg0: i32, %arg1: i32) -> (i32, i32, i32) {
    %c0_i32 = arith.constant 0 : i32
    %c0_i32_0 = arith.constant 0 : i32
    return %arg1, %arg0, %c0_i32 : i32, i32, i32
  }
}

</mosaic_0001>

<bundles_post_ra>
// kernel: tpu_custom_call.1
= control target key start
LH: loop header
LB: loop body
LE: loop exit
PB: predicated region body
PF: predicated region fallthrough
CT: control target
= control target key end

     0   :  { %12 = vsyncpa [#allocation3], 0  ;;  %s1086_s0 = inlined_call_operand.vmem [shape: f32[2,8,4], index: 0, kind: input, shape index: {}]   ;;  %s1087_s1 = inlined_call_operand.vmem [shape: f32[2,8,4], index: 1, kind: input, shape index: {}]   ;;  %s1088_s2 = inlined_call_operand.vmem [shape: f32[2,8,4], index: 2, kind: input, shape index: {}]   ;;  %s1089_s3 = inlined_call_operand.vmem [shape: f32[4,32], index: 3, kind: input, shape index: {}]   ;;  %s1090_s4 = inlined_call_operand.vmem [shape: f32[4,32], index: 4, kind: input, shape index: {}]   ;;  %s1091_s5 = inlined_call_operand.vmem [shape: f32[4,32], index: 5, kind: input, shape index: {}]   ;;  %s1092_s6 = inlined_call_operand.vmem [shape: f32[8,32], index: 6, kind: input, shape index: {}]   ;;  %s1093_s7 = inlined_call_operand.hbm [shape: f32[2,8,32], index: 7, kind: output, shape index: {}]  }
   0x1   :  { %14 = vsyncpa [#allocation3 + $0x1], 0  ;;  %s963_s24 = smov 0   ;;  %s965_s25 = smov 0  }
   0x2   :  { %s967_s26 = smov 0   ;;  %s969_s27 = smov 0  }
   0x3   :  { %s971_s28 = smov 0   ;;  %s973_s29 = smov 0  }
   0x4 LB: > { %s744_s30 = sadd.s32 4294967295, %s918_s29   ;;  %s745_s8 = sadd.s32 4294967294, %s918_s29   ;;  %s918_s29 = sphi %s973_s29, %s20_s29   ;;  %s914_s28 = sphi %s971_s28, %s1100_s28   ;;  %s910_s27 = sphi %s969_s27, %s1099_s27   ;;  %s906_s26 = sphi %s967_s26, %s1098_s26   ;;  %s902_s25 = sphi %s965_s25, %s1097_s25   ;;  %s898_s24 = sphi %s963_s24, %s1096_s24  }
   0x5   : > { %s29_s9 = sadd.s32 1, %s914_s28  ;;  %s214_s10 = sadd.s32 1, %s906_s26 }
   0x6   : > { %p30_p0 = scmp.ge.s32.totalorder %s29_s9, 2  ;;  %p224_p1 = scmp.ne.s32.totalorder %s906_s26, %s902_s25 }
   0x7   : > { %p225_p2 = scmp.eq.s32.totalorder %s744_s30, 1  ;;  %p230_p3 = scmp.ne.s32.totalorder %s902_s25, %s898_s24 }
   0x8   : > { %s1102_s9 = smov (%p30_p0, %s29_s9), 0  ;;  %p231_p5 = scmp.eq.s32.totalorder %s745_s8, 1 }
   0x9   : > { %p1003_p4 = por %p225_p2, %p224_p1  ;;  %s209_s12 = ssub.s32 %s914_s28, %s1102_s9 }
   0xa   : > { %p749_p6 = scmp.ge.s32.totalorder %s918_s29, 1  ;;  %p212_p7 = scmp.eq.s32.totalorder %s209_s12, 0 }
   0xb   : > { %p1010_p8 = por %p231_p5, %p230_p3  ;;  %p295_p9 = scmp.lt.s32.totalorder %s918_s29, 3 }
   0xc   : > { %s1016_s14 = scalar_select %p212_p7, %s906_s26, %s214_s10  }
   0xd   : > { %p296_p10 = pnand %p749_p6, %p295_p9 }
   0xe   : > { %p347_p11 = scmp.lt.s32.totalorder (!%p296_p10), %s910_s27, 1 }
   0xf   : > { %299 = sbr.rel (%p296_p10) target bundleno = 239 (0xef), region = 48 }
  0x14   : > { %v375_v0 = vld [vmem:[%s1090_s4] sm:$0xf]  ;;  %vm380_vm0 = vcmask 1043456   ;;  %v920_v1 = vmov 0.0   ;;  %vm921_vm1 = vmmov 0   ;;  %s348_s19 = scalar_select %p347_p11, %s910_s27, 1 }
  0x15   : > { %770 = vmatprep.subr.mxu0 %v920_v1  ;;  %775 = vmatprep.subr.mxu1 %v920_v1  ;;  %v373_v2 = vld [vmem:[%s1089_s3] sm:$0xf]  ;;  %vm376_vm2 = vcmask 31744   ;;  %vm611_vm3 = vcmask 261120  }
  0x16   : > { %771 = vmatpush3.msk.msra.mxu0 %vm380_vm0, %v375_v0  ;;  %772 = vmatprep.mubr.msk.f32.mxu0 %vm921_vm1, %v920_v1  ;;  %s751_s20 = sshll.u32 %s348_s19, 3  ;;  %v531_v3 = vld [vmem:[%s1091_s5] sm:$0xf]  ;;  %s344_s19 = sand.u32 1, %s902_s25  }
  0x17   : > { %776 = vmatpush3.msk.msra.mxu1 %vm380_vm0, %v373_v2  ;;  %777 = vmatprep.mubr.msk.f32.mxu1 %vm921_vm1, %v920_v1  ;;  %s360_s23 = scalar_lea.vmem %s1087_s1, %s751_s20  ;;  %s353_s10 = scalar_lea.vmem %s1086_s0, %s751_s20  ;;  %v609_v13 = vld [vmem:[%s1092_s6] sm:$0xff] }
  0x18   : > { %780 = vmatprep.subr.mxu0 %v920_v1  ;;  %v374_v4 = vld [vmem:[%s360_s23] sm:$0xff]  ;;  %s367_s18 = scalar_lea.vmem %s1088_s2, %s751_s20  ;;  %s750_s21 = sshll.u32 %s344_s19, 3 }
  0x19   : > { %v372_v5 = vld [vmem:[%s353_s10] sm:$0xff]  ;;  %773 = vmatmul.mubr.msk.f32.vlgmr.msra.gmra.mxu0 %vm376_vm2, %v374_v4  ;;  %s761_s23 = sshll.u32 %s910_s27, 7  ;;  %s346_s30 = scalar_lea.vmem [#allocation2], %s750_s21 }
  0x1a   : > { %778 = vmatmul.mubr.msk.f32.vlgmr.msra.gmra.mxu1 %vm376_vm2, %v372_v5  ;;  %781 = vmatpush3.msk.msra.mxu0 %vm380_vm0, %v531_v3  ;;  %v530_v6 = vld [vmem:[%s367_s18] sm:$0xff]  ;;  %s628_s8 = sshll.u32 %s346_s30, 4  ;;  %s626_s15 = scalar_lea.hbm %s1093_s7, %s761_s23  ;;  %s629_s8 = int_to_ptr.vmem [resolvable:$true] %s628_s8 }
  0x1b   : > { %782 = vmatprep.mubr.msk.f32.mxu0 %vm921_vm1, %v920_v1  ;;  %s614_s16 = scalar_lea.sflag [#allocation3], %s344_s19  ;;  %s842_s17 = scalar_lea.vmem %s629_s8, 128 }
  0x1c   : > { %p843_p12 = scmp.ne.s32.totalorder %s629_s8, %s842_s17  ;;  %s922_s18 = smov [#allocation2]  }
  0x1d   : > { %783 = vmatmul.mubr.msk.f32.vlgmr.msra.gmra.mxu0 %vm376_vm2, %v530_v6  ;;  %s846_s27 = sshll.u32 %s922_s18, 4  ;;  %s847_s27 = int_to_ptr.vmem [resolvable:$false] %s846_s27 }
  0x1e   : > { %p844_p13 = pnand %p843_p12, %p1003_p4  ;;  %s848_s21 = scalar_lea.vmem %s847_s27, 256 }
  0x1f   : > { %p849_p1 = scmp.lt.s32.totalorder %s629_s8, %s847_s27  ;;  %p850_p2 = scmp.lt.s32.totalorder %s848_s21, %s842_s17 }
  0x20   : > { %p845_p0 = pneg %p844_p13 }
  0x21   : > { %p851_p3 = por %p850_p2, %p849_p1 }
  0x23   : > { %p852_p5 = pnand %p851_p3, %p845_p0 }
  0xd9   : > { %v450_v7 = vpop.f32.mrf.mxu0 }
  0xda   : > { %v526_v8 = vpop.f32.mrf.mxu1 }
  0xdb   : > { %v774_v9 = vpop.f32.mrf.mxu0  ;;  %v527_v11 = vadd.f32 %v526_v8, %v450_v7 }
  0xdc   : > { %v779_v10 = vpop.f32.mrf.mxu1 }
  0xdd   : > { %v604_v12 = vpop.f32.mrf.mxu0 }
  0xde   : > { %v608_v14 = vadd.f32 %v604_v12, %v527_v11 }
  0xdf   : > { %v784_v15 = vpop.f32.mrf.mxu0 }
  0xe0   : > { %v610_v16 = vadd.f32 %v609_v13, %v608_v14 }
  0xe2   : > { %612 = vst.msk [vmem:[%s346_s30] sm:$0xff] %vm611_vm3, %v610_v16 }
  0xe3   : > { %855 = shalt.err (!%p852_p5)
}
  0xe4   : > { %s856_s22 = scalar_lea.hbm %s626_s15, 128  ;;  %s860_s23 = scalar_lea.hbm %s1093_s7, 256 }
  0xe5   : > { %p857_p6 = scmp.ne.s32.totalorder %s626_s15, %s856_s22  ;;  %p861_p10 = scmp.lt.s32.totalorder %s626_s15, %s1093_s7 }
  0xe6   : > { %p862_p11 = scmp.lt.s32.totalorder %s860_s23, %s856_s22 }
  0xe7   : > { %p858_p7 = pnand %p857_p6, %p1003_p4 }
  0xe8   : > { %p863_p12 = por %p862_p11, %p861_p10 }
  0xe9   : > { %p859_p9 = pneg %p858_p7 }
  0xeb   : > { %p864_p13 = pnand %p863_p12, %p859_p9 }
  0xed   : > { %867 = shalt.err (!%p864_p13)
}
  0xee   : > { %785 = dma.vmem_to_hbm [thread:$0]  (%p1003_p4), %s629_s8, 128, %s626_s15, %s614_s16  }
  0xef PF: > { %p791_p0 = scmp.ge.s32.totalorder %s918_s29, 2  ;;  %s640_s12 = sand.u32 1, %s898_s24  }
  0xf0   : > { %s641_s17 = scalar_lea.sflag [#allocation3], %s640_s12 }
  0xf1   : > { %p788_p1 = pnand %p791_p0, %p1010_p8 }
  0xf3   : > { %p789_p2 = pneg %p788_p1 }
  0xf5   : > { %893 = dma.done.wait (%p789_p2), %s641_s17, 128  }
  0xf6   : > { %895 = vsyncadd (%p789_p2), %s641_s17, 4294967168  ;;  %s20_s29 = sadd.s32 1, %s918_s29   ;;  %s1096_s24 = smov %s902_s25 }
  0xf7   : > { %p17_p3 = scmp.ge.s32.totalorder %s20_s29, 4   ;;  %s1097_s25 = smov %s906_s26 }
  0xf8   : > { %s1098_s26 = smov %s1016_s14  ;;  %s1099_s27 = smov %s914_s28 }
  0xf9   : > { %s1100_s28 = smov %s1102_s9  ;;  %19 = sbr.rel (!%p17_p3) target bundleno = 4 (0x4), region = 92 }
  0xfe   :  { %646 = vsyncpa [#allocation3], 1 }
  0xff   :  { %648 = vsyncpa [#allocation3 + $0x1], 1 }

</bundles_post_ra>
